<compile_context>
chip_gen: v7x
topology: tpu7x:2x2x1
jax: 0.10.0
libtpu: 0.0.40
codegen_flags: <defaults>
</compile_context>

<pallas_src>
import jax
import jax.numpy as jnp
import numpy as np
from jax.experimental import pallas as pl
from jax.experimental.pallas import tpu as pltpu

_IMAGENET_MEAN = (0.485, 0.456, 0.406)
_IMAGENET_STD = (0.229, 0.224, 0.225)


# ----------------------------------------------------------------------------
# Fused kernel (single block, no grid):
#   grad_ref : [C, HW]  gradient from the backward hook (native layout)
#   fp_ref   : [C, HW]  feature map from the forward hook
#   img_ref  : [3, HW]  normalized input image, spatially flattened
# outputs:
#   cam_ref     : [1, HW]  uint8-valued f32 heatmap (clip + floor applied)
#   overlay_ref : [3, HW]  0.5 * heatmap + 0.3 * denormalized uint8-valued img
# ----------------------------------------------------------------------------
def _fused_cam_kernel(grad_ref, fp_ref, img_ref, cam_ref, overlay_ref):
    C, HW = grad_ref.shape
    g = grad_ref[...]      # native dtype (bf16 stays bf16; f32 accumulation)
    f = fp_ref[...]

    # w = adaptive_avg_pool2d(grad, (1,1)) -> per-channel spatial mean, [C, 1].
    # (C,HW) @ (HW,1) with f32 accumulation; no [HW, C] transpose anywhere.
    ones_col = jnp.ones((HW, 1), dtype=g.dtype)
    w_col = jnp.dot(g, ones_col, preferred_element_type=jnp.float32) * (1.0 / HW)

    # cam = (w * fp).sum(channels): contract C of [C,1] against C of [C,HW].
    cam = jax.lax.dot_general(
        w_col.astype(f.dtype), f,
        dimension_numbers=(((0,), (0,)), ((), ())),
        preferred_element_type=jnp.float32)                         # [1, HW]

    # Normalization. The PyTorch reference is in-place (`cam -= min` THEN
    # `cam /= max`), so the divisor is max(cam - min); matched here.
    cam = cam - jnp.min(cam, keepdims=True)
    inv_mx = pl.reciprocal(jnp.maximum(jnp.max(cam, keepdims=True), 1e-12),
                           approx=True)                              # EUP
    cam = cam * (255.0 * inv_mx)
    # np.uint8(...) value; clipped (wrap-around would surely be unintended,
    # and the normalized cam*255 already lies in [0, 255] so clip is exact).
    cam_q = jnp.floor(jnp.clip(cam, 0.0, 255.0))                     # [1, HW]
    cam_ref[...] = cam_q

    # Image denormalization + overlay, all 3 channels in one vectorized pass:
    #   (img * std + mean) * 255 == img * (std*255) + (mean*255)
    # Channel constants are built from a sublane iota + selects, so they stay
    # trace-time scalars (no extra operands, DMAs or dense-constant vregs).
    ch = jax.lax.broadcasted_iota(jnp.int32, (3, 1), 0)              # [[0],[1],[2]]
    std255 = jnp.where(
        ch == 0, _IMAGENET_STD[0] * 255.0,
        jnp.where(ch == 1, _IMAGENET_STD[1] * 255.0, _IMAGENET_STD[2] * 255.0))
    mean255 = jnp.where(
        ch == 0, _IMAGENET_MEAN[0] * 255.0,
        jnp.where(ch == 1, _IMAGENET_MEAN[1] * 255.0, _IMAGENET_MEAN[2] * 255.0))
    den = img_ref[...].astype(jnp.float32) * std255 + mean255        # [3, HW]
    den_q = jnp.floor(jnp.clip(den, 0.0, 255.0))                     # uint8 values

    # overlay = 0.5 * heatmap + 0.3 * img ; cam_q broadcasts over the 3
    # channel sublanes.
    overlay_ref[...] = 0.5 * cam_q + 0.3 * den_q


def _fused_cam_call(grad2, fp2, img2):
    C, HW = fp2.shape
    vmem = pltpu.MemorySpace.VMEM
    return pl.pallas_call(
        _fused_cam_kernel,
        out_shape=(
            jax.ShapeDtypeStruct((1, HW), jnp.float32),
            jax.ShapeDtypeStruct((3, HW), jnp.float32),
        ),
        in_specs=[
            pl.BlockSpec((C, HW), lambda: (0, 0), memory_space=vmem),
            pl.BlockSpec((C, HW), lambda: (0, 0), memory_space=vmem),
            pl.BlockSpec((3, HW), lambda: (0, 0), memory_space=vmem),
        ],
        out_specs=(
            pl.BlockSpec((1, HW), lambda: (0, 0), memory_space=vmem),
            pl.BlockSpec((3, HW), lambda: (0, 0), memory_space=vmem),
        ),
    )(grad2, fp2, img2)


@jax.jit
def cam_forward(img, fp, grad):
    """Pallas version of Cam.forward's computable portion.

    img  : [1, 3, Hi, Wi]  normalized input image
    fp   : [C, Hf, Wf]     captured feature map  (forward hook, batch squeezed)
    grad : [C, Hf, Wf]     captured gradient     (backward hook, batch squeezed)
    Returns (heatmap uint8 [Hf, Wf, 1], overlay float32 [Hi, Wi, 3]).
    """
    # TODO(synk): ResNet18 forward + autograd backward (hook capture) has no
    # Pallas equivalent; fp/grad are provided as synthetic hook outputs.
    C, Hf, Wf = fp.shape
    N, CI, Hi, Wi = img.shape
    HWf, HWi = Hf * Wf, Hi * Wi
    assert N == 1 and CI == 3
    # TODO(synk): cv2.resize / cv2.applyColorMap are host-side OpenCV ops; the
    # overlay uses the raw cam, which requires matching spatial sizes here.
    assert HWf == HWi

    grad2 = grad.reshape(C, HWf)             # native [C, HW]; NO transpose
    fp2 = fp.reshape(C, HWf)                 # [C, HW]
    img2 = img.reshape(3, HWi)               # [3, HW]

    cam_q, overlay = _fused_cam_call(grad2, fp2, img2)

    # .squeeze(0).unsqueeze(2) -> [Hf, Wf, 1]; values already clipped/floored
    # in-kernel so the uint8 cast is exact.
    heatmap = cam_q.reshape(Hf, Wf)[..., None].astype(jnp.uint8)
    # permute(0, 2, 3, 1).squeeze(0) -> [Hi, Wi, 3]  (cheap XLA transpose)
    overlay = overlay.reshape(3, Hi, Wi).transpose(1, 2, 0)
    return heatmap, overlay


if __name__ == "__main__":
    key = jax.random.PRNGKey(0)
    k1, k2, k3 = jax.random.split(key, 3)

    C, Hf, Wf = 32, 16, 16       # small stand-in for layer4 (512, 7, 7)
    Hi, Wi = 16, 16              # small stand-in for 224x224 input

    fp = jax.random.normal(k1, (C, Hf, Wf), dtype=jnp.float32)
    grad = jax.random.normal(k2, (C, Hf, Wf), dtype=jnp.float32)
    img = jax.random.normal(k3, (1, 3, Hi, Wi), dtype=jnp.float32) * 0.5

    heatmap, overlay = cam_forward(img, fp, grad)
    jax.block_until_ready((heatmap, overlay))

    # ----- pure-JAX reference of the hot path -----
    w_ref = jnp.mean(grad, axis=(1, 2), keepdims=True)            # [C,1,1]
    cam_r = jnp.sum(w_ref * fp, axis=0)                           # [Hf,Wf]
    cam_r = cam_r - jnp.min(cam_r)
    cam_r = cam_r / jnp.max(cam_r) * 255.0
    cam_q_r = jnp.floor(jnp.clip(cam_r, 0.0, 255.0))              # uint8 values

    mean = jnp.array([0.485, 0.456, 0.406], jnp.float32).reshape(3, 1, 1)
    std = jnp.array([0.229, 0.224, 0.225], jnp.float32).reshape(3, 1, 1)
    img_r = jnp.floor(jnp.clip((img[0] * std + mean) * 255.0, 0.0, 255.0))
    overlay_r = (0.5 * cam_q_r[None, :, :] + 0.3 * img_r).transpose(1, 2, 0)

    # atol=1.0 tolerates +/-1 quantization (floor) flips at integer boundaries
    # from MXU-vs-VPU accumulation order / approx-reciprocal differences.
    np.testing.assert_allclose(
        np.asarray(heatmap[..., 0], dtype=np.float32), np.asarray(cam_q_r), atol=1.0)
    np.testing.assert_allclose(
        np.asarray(overlay), np.asarray(overlay_r), atol=1.0)

    assert heatmap.dtype == jnp.uint8 and heatmap.shape == (Hf, Wf, 1)
    assert overlay.shape == (Hi, Wi, 3)

    print("KERNEL_OK")
</pallas_src>

<mosaic_0001>
module attributes {stable_mosaic.version = 11 : i64} {
  func.func @_fused_cam_kernel(%arg0: memref<32x256xf32, #tpu.memory_space<vmem>>, %arg1: memref<32x256xf32, #tpu.memory_space<vmem>>, %arg2: memref<3x256xf32, #tpu.memory_space<vmem>>, %arg3: memref<1x256xf32, #tpu.memory_space<vmem>>, %arg4: memref<3x256xf32, #tpu.memory_space<vmem>>) attributes {dimension_semantics = [], scalar_prefetch = 0 : i64, scratch_operands = 0 : i64, tpu.core_type = #tpu.core_type<tc>} {
    %c0 = arith.constant 0 : index
    %c0_0 = arith.constant 0 : index
    %0 = vector.load %arg0[%c0, %c0_0] : memref<32x256xf32, #tpu.memory_space<vmem>>, vector<32x256xf32>
    %c0_1 = arith.constant 0 : index
    %c0_2 = arith.constant 0 : index
    %1 = vector.load %arg1[%c0_1, %c0_2] : memref<32x256xf32, #tpu.memory_space<vmem>>, vector<32x256xf32>
    %cst = arith.constant 1.000000e+00 : f32
    %2 = vector.broadcast %cst : f32 to vector<256x1xf32>
    %cst_3 = arith.constant dense<0.000000e+00> : vector<32x1xf32>
    %3 = tpu.matmul %0, %2, %cst_3 {dimension_numbers = #tpu.dot_dimension_numbers<[1], [0], [0], [1], [0, 0, 1, 1], [], []>} : vector<32x256xf32>, vector<256x1xf32>, vector<32x1xf32> -> vector<32x1xf32>
    %cst_4 = arith.constant 3.906250e-03 : f32
    %4 = vector.broadcast %cst_4 : f32 to vector<32x1xf32>
    %5 = arith.mulf %3, %4 : vector<32x1xf32>
    %cst_5 = arith.constant dense<0.000000e+00> : vector<1x256xf32>
    %6 = tpu.matmul %5, %1, %cst_5 {dimension_numbers = #tpu.dot_dimension_numbers<[0], [0], [1], [1], [0, 1, 1, 1], [], []>} : vector<32x1xf32>, vector<32x256xf32>, vector<1x256xf32> -> vector<1x256xf32>
    %7 = vector.shape_cast %6 : vector<1x256xf32> to vector<1x1x256xf32>
    %cst_6 = arith.constant dense<0x7F800000> : vector<1xf32>
    %8 = vector.multi_reduction <minimumf>, %7, %cst_6 [1, 2] : vector<1x1x256xf32> to vector<1xf32>
    %9 = vector.shape_cast %8 : vector<1xf32> to vector<1x1x1xf32>
    %10 = vector.extract %9[0, 0, 0] : f32 from vector<1x1x1xf32>
    %11 = vector.broadcast %10 : f32 to vector<1x1xf32>
    %12 = vector.broadcast %11 : vector<1x1xf32> to vector<1x256xf32>
    %13 = arith.subf %6, %12 : vector<1x256xf32>
    %14 = vector.shape_cast %13 : vector<1x256xf32> to vector<1x1x256xf32>
    %cst_7 = arith.constant dense<0xFF800000> : vector<1xf32>
    %15 = vector.multi_reduction <maximumf>, %14, %cst_7 [1, 2] : vector<1x1x256xf32> to vector<1xf32>
    %16 = vector.shape_cast %15 : vector<1xf32> to vector<1x1x1xf32>
    %17 = vector.extract %16[0, 0, 0] : f32 from vector<1x1x1xf32>
    %18 = vector.broadcast %17 : f32 to vector<1x1xf32>
    %cst_8 = arith.constant 9.99999996E-13 : f32
    %19 = vector.broadcast %cst_8 : f32 to vector<1x1xf32>
    %20 = arith.maximumf %18, %19 : vector<1x1xf32>
    %21 = tpu.reciprocal %20 {approx = true} : vector<1x1xf32> -> vector<1x1xf32>
    %cst_9 = arith.constant 2.550000e+02 : f32
    %22 = vector.broadcast %cst_9 : f32 to vector<1x1xf32>
    %23 = arith.mulf %22, %21 : vector<1x1xf32>
    %24 = vector.broadcast %23 : vector<1x1xf32> to vector<1x256xf32>
    %25 = arith.mulf %13, %24 : vector<1x256xf32>
    %cst_10 = arith.constant 0.000000e+00 : f32
    %cst_11 = arith.constant 2.550000e+02 : f32
    %26 = vector.broadcast %cst_10 : f32 to vector<1x256xf32>
    %27 = arith.maximumf %26, %25 : vector<1x256xf32>
    %28 = vector.broadcast %cst_11 : f32 to vector<1x256xf32>
    %29 = arith.minimumf %28, %27 : vector<1x256xf32>
    %30 = math.floor %29 : vector<1x256xf32>
    %c0_12 = arith.constant 0 : index
    %c0_13 = arith.constant 0 : index
    %31 = vector.load %arg3[%c0_12, %c0_13] : memref<1x256xf32, #tpu.memory_space<vmem>>, vector<1x256xf32>
    tpu.vector_store %arg3[%c0_12, %c0_13], %30 {strides = array<i32>} : memref<1x256xf32, #tpu.memory_space<vmem>>, vector<1x256xf32>,
    %32 = tpu.iota {dimensions = array<i32: 0>} : vector<3x1xi32>
    %c0_i32 = arith.constant 0 : i32
    %33 = vector.broadcast %c0_i32 : i32 to vector<3x1xi32>
    %34 = arith.cmpi eq, %32, %33 : vector<3x1xi32>
    %c1_i32 = arith.constant 1 : i32
    %35 = vector.broadcast %c1_i32 : i32 to vector<3x1xi32>
    %36 = arith.cmpi eq, %32, %35 : vector<3x1xi32>
    %cst_14 = arith.constant 5.712000e+01 : f32
    %cst_15 = arith.constant 5.737500e+01 : f32
    %37 = vector.broadcast %cst_14 : f32 to vector<3x1xf32>
    %38 = vector.broadcast %cst_15 : f32 to vector<3x1xf32>
    %39 = arith.select %36, %37, %38 : vector<3x1xi1>, vector<3x1xf32>
    %cst_16 = arith.constant 5.839500e+01 : f32
    %40 = vector.broadcast %cst_16 : f32 to vector<3x1xf32>
    %41 = arith.select %34, %40, %39 : vector<3x1xi1>, vector<3x1xf32>
    %c0_i32_17 = arith.constant 0 : i32
    %42 = vector.broadcast %c0_i32_17 : i32 to vector<3x1xi32>
    %43 = arith.cmpi eq, %32, %42 : vector<3x1xi32>
    %c1_i32_18 = arith.constant 1 : i32
    %44 = vector.broadcast %c1_i32_18 : i32 to vector<3x1xi32>
    %45 = arith.cmpi eq, %32, %44 : vector<3x1xi32>
    %cst_19 = arith.constant 1.162800e+02 : f32
    %cst_20 = arith.constant 1.035300e+02 : f32
    %46 = vector.broadcast %cst_19 : f32 to vector<3x1xf32>
    %47 = vector.broadcast %cst_20 : f32 to vector<3x1xf32>
    %48 = arith.select %45, %46, %47 : vector<3x1xi1>, vector<3x1xf32>
    %cst_21 = arith.constant 1.236750e+02 : f32
    %49 = vector.broadcast %cst_21 : f32 to vector<3x1xf32>
    %50 = arith.select %43, %49, %48 : vector<3x1xi1>, vector<3x1xf32>
    %c0_22 = arith.constant 0 : index
    %c0_23 = arith.constant 0 : index
    %51 = vector.load %arg2[%c0_22, %c0_23] : memref<3x256xf32, #tpu.memory_space<vmem>>, vector<3x256xf32>
    %52 = vector.broadcast %41 : vector<3x1xf32> to vector<3x256xf32>
    %53 = arith.mulf %51, %52 : vector<3x256xf32>
    %54 = vector.broadcast %50 : vector<3x1xf32> to vector<3x256xf32>
    %55 = arith.addf %53, %54 : vector<3x256xf32>
    %cst_24 = arith.constant 0.000000e+00 : f32
    %cst_25 = arith.constant 2.550000e+02 : f32
    %56 = vector.broadcast %cst_24 : f32 to vector<3x256xf32>
    %57 = arith.maximumf %56, %55 : vector<3x256xf32>
    %58 = vector.broadcast %cst_25 : f32 to vector<3x256xf32>
    %59 = arith.minimumf %58, %57 : vector<3x256xf32>
    %60 = math.floor %59 : vector<3x256xf32>
    %cst_26 = arith.constant 5.000000e-01 : f32
    %61 = vector.broadcast %cst_26 : f32 to vector<1x256xf32>
    %62 = arith.mulf %61, %30 : vector<1x256xf32>
    %cst_27 = arith.constant 3.000000e-01 : f32
    %63 = vector.broadcast %cst_27 : f32 to vector<3x256xf32>
    %64 = arith.mulf %63, %60 : vector<3x256xf32>
    %65 = vector.broadcast %62 : vector<1x256xf32> to vector<3x256xf32>
    %66 = arith.addf %65, %64 : vector<3x256xf32>
    %c0_28 = arith.constant 0 : index
    %c0_29 = arith.constant 0 : index
    %67 = vector.load %arg4[%c0_28, %c0_29] : memref<3x256xf32, #tpu.memory_space<vmem>>, vector<3x256xf32>
    tpu.vector_store %arg4[%c0_28, %c0_29], %66 {strides = array<i32>} : memref<3x256xf32, #tpu.memory_space<vmem>>, vector<3x256xf32>,
    return
  }
}

</mosaic_0001>

<bundles_post_ra>
// kernel: cam_forward.1
= control target key start
LH: loop header
LB: loop body
LE: loop exit
PB: predicated region body
PF: predicated region fallthrough
CT: control target
= control target key end

     0   :  { %v433_v0 = vmov 1.0|1.0   ;;  %v434_v12 = vmov 0.0   ;;  %vm153_vm0 = vcmask 261120   ;;  %vm228_vm1 = vcmask 1040384   ;;  %s525_s0 = inlined_call_operand.vmem [shape: f32[32,256], index: 0, kind: input, shape index: {}]   ;;  %s526_s1 = inlined_call_operand.vmem [shape: f32[32,256], index: 1, kind: input, shape index: {}]   ;;  %s527_s2 = inlined_call_operand.vmem [shape: f32[3,256], index: 2, kind: input, shape index: {}]   ;;  %s528_s3 = inlined_call_operand.vmem [shape: f32[1,256], index: 3, kind: output, shape index: {0}]   ;;  %s529_s4 = inlined_call_operand.vmem [shape: f32[3,256], index: 4, kind: output, shape index: {1}]  }
   0x1   :  { %397 = vmatprep.subr.bf16.mxu0 %v433_v0  ;;  %v17_v1 = vld [vmem:[%s525_s0 + $0x8] sm:$0xff]  ;;  %v16_v2 = vld [vmem:[%s525_s0] sm:$0xff]  ;;  %v19_v3 = vld [vmem:[%s525_s0 + $0x18] sm:$0xff]  ;;  %221 = vmatprep.mubr.f32.mxu1 %v434_v12 }
   0x2   :  { %398 = vmatpush3.bf16.msra.mxu0 %v433_v0  ;;  %96 = vmatprep.mubr.f32.mxu0 %v17_v1  ;;  %v18_v4 = vld [vmem:[%s525_s0 + $0x10] sm:$0xff]  ;;  %v21_v5 = vld [vmem:[%s525_s0 + $0x28] sm:$0xff]  ;;  %v20_v6 = vld [vmem:[%s525_s0 + $0x20] sm:$0xff] }
   0x3   :  { %399 = vmatprep.subr.bf16.mxu0 %v433_v0  ;;  %v23_v7 = vld [vmem:[%s525_s0 + $0x38] sm:$0xff]  ;;  %v22_v8 = vld [vmem:[%s525_s0 + $0x30] sm:$0xff]  ;;  %v25_v9 = vld [vmem:[%s526_s1 + $0x8] sm:$0xff] }
   0x4   :  { %v27_v10 = vld [vmem:[%s526_s1 + $0x18] sm:$0xff]  ;;  %v24_v11 = vld [vmem:[%s526_s1] sm:$0xff]  ;;  %v26_v14 = vld [vmem:[%s526_s1 + $0x10] sm:$0xff] }
   0x5   :  { %v413_v13 = vpack.c.bf16 %v27_v10, %v25_v9  ;;  %v29_v15 = vld [vmem:[%s526_s1 + $0x28] sm:$0xff]  ;;  %v31_v16 = vld [vmem:[%s526_s1 + $0x38] sm:$0xff]  ;;  %v415_v17 = vpack.c.bf16 %v26_v14, %v24_v11  ;;  %v28_v19 = vld [vmem:[%s526_s1 + $0x20] sm:$0xff]  ;;  %v437_v9 = vmov 103.53  }
   0x6   :  { %400 = vmatpush3.bf16.msra.mxu0 %v433_v0  ;;  %v417_v18 = vpack.c.bf16 %v31_v16, %v29_v15  ;;  %v30_v20 = vld [vmem:[%s526_s1 + $0x30] sm:$0xff] }
   0x7   :  { %401 = vmatprep.subr.bf16.mxu0 %v433_v0  ;;  %414 = vmatprep.subr.bf16.mxu1 %v413_v13  ;;  %v419_v21 = vpack.c.bf16 %v30_v20, %v28_v19  ;;  %v299_v13 = vld [vmem:[%s527_s2] sm:$0x77] }
   0x8   :  { %416 = vmatpush1.bf16.msra.mxu1 %v415_v17 }
   0x9   :  { %418 = vmatprep.subr.bf16.mxu1 %v417_v18 }
   0xa   :  { %402 = vmatpush3.bf16.msra.mxu0 %v433_v0 }
   0xb   :  { %403 = vmatprep.subr.bf16.mxu0 %v433_v0 }
   0xc   :  { %420 = vmatpush1.bf16.msra.mxu1 %v419_v21 }
   0xe   :  { %404 = vmatpush3.bf16.msra.mxu0 %v433_v0 }
   0xf   :  { %405 = vmatprep.subr.bf16.mxu0 %v433_v0 }
  0x12   :  { %406 = vmatpush3.bf16.msra.mxu0 %v433_v0 }
  0x13   :  { %407 = vmatprep.subr.bf16.mxu0 %v433_v0 }
  0x16   :  { %408 = vmatpush3.bf16.msra.mxu0 %v433_v0 }
  0x17   :  { %409 = vmatprep.subr.bf16.mxu0 %v433_v0 }
  0x1a   :  { %410 = vmatpush3.bf16.msra.mxu0 %v433_v0 }
  0x1b   :  { %411 = vmatprep.subr.bf16.mxu0 %v433_v0 }
  0x1e   :  { %412 = vmatpush3.bf16.msra.mxu0 %v433_v0  ;;  %v274_v0 = vlaneseq }
  0x20   :  { %v275_v1 = vshrl.u32 %v274_v0, 7  ;;  %vm288_vm4 = vcmp.lt.s32.totalorder %v274_v0, 256 }
  0x21   :  { %97 = vmatmul.mubr.f32.vlgmr.msra.gmra.mrb[0].mxu0 %v16_v2  ;;  %v435_v2 = vmov 839922192  }
  0x22   :  { %101 = vmatprep.mubr.f32.mxu0 %v19_v3  ;;  %v302_v3 = vunpack.c.l.s4 %v435_v2  ;;  %vm294_vm2 = vcmp.eq.s32.totalorder %v275_v1, 1  ;;  %vm293_vm3 = vcmp.eq.s32.totalorder %v275_v1, 0 }
  0x23   :  { %v297_v10 = vsel %vm294_vm2, 116.28, %v437_v9 }
  0x24   :  { %v298_v12 = vsel %vm293_vm3, 123.675, %v297_v10 }
  0x25   :  { %102 = vmatmul.mubr.f32.gmra.mrb[2].mxu0 %v18_v4  ;;  %v303_v4 = vunpack.c.0.s8 %v302_v3 }
  0x26   :  { %106 = vmatprep.mubr.f32.mxu0 %v21_v5  ;;  %v436_v5 = vmov 57.375  }
  0x29   :  { %107 = vmatmul.mubr.f32.gmra.mrb[4].mxu0 %v20_v6  ;;  %v295_v6 = vsel %vm294_vm2, 57.12, %v436_v5 }
  0x2a   :  { %111 = vmatprep.mubr.f32.mxu0 %v23_v7  ;;  %v306_v7 = vsub.s32 %v303_v4, %v275_v1 }
  0x2c   :  { %v317_v16 = vrot.slane %v298_v12, %v306_v7 }
  0x2d   :  { %112 = vmatmul.mubr.f32.gmra.mrb[6].mxu0 %v22_v8  ;;  %v296_v8 = vsel %vm293_vm3, 58.395, %v295_v6 }
  0x2e   :  { %v307_v11 = vrot.slane %v296_v8, %v306_v7 }
  0x30   :  { %v309_v15 = vmul.f32 %v307_v11, %v299_v13 }
  0x32   :  { %v319_v18 = vadd.f32 %v317_v16, %v309_v15 }
  0x34   :  { %v320_v19 = vmax.f32 %v319_v18, 0.0 }
  0x36   :  { %v321_v20 = vmin.f32 %v320_v19, 255.0 }
  0xf4   :  { %v385_v22 = vpop.f32.mrb[0].mxu0 }
  0xf5   :  { %v386_v23 = vpop.f32.mrb[1].mxu0 }
  0xf6   :  { %v387_v24 = vadd.f32 %v386_v23, %v385_v22  ;;  %v438_v23 = vmov 1966171168  }
  0xf8   :  { %v388_v25 = vpop.f32.mrb[2].mxu0  ;;  %v117_v26 = vmul.f32 0.00390625, %v387_v24  ;;  %v272_v24 = vunpack.c.l.s4 %v438_v23 }
  0xf9   :  { %v389_v27 = vpop.f32.mrb[3].mxu0 }
  0xfa   :  { %v390_v28 = vadd.f32 %v389_v27, %v388_v25  ;;  %121 = vxpose.xlu0.b32.start [1/4] (short) (narrow) %v117_v26, 8  ;;  %v322_v27 = vfloor.f32 %v321_v20 }
  0xfc   :  { %v118_v29 = vmul.f32 0.00390625, %v390_v28  ;;  %v391_v30 = vpop.f32.mrb[4].mxu0 }
  0xfd   :  { %v392_v31 = vpop.f32.mrb[5].mxu0 }
  0xfe   :  { %v393_v32 = vadd.f32 %v392_v31, %v391_v30  ;;  %122 = vxpose.xlu0.b32.cont [2/4] (short) (narrow) %v118_v29, 8  ;;  %v273_v30 = vunpack.c.0.s8 %v272_v24 }
 0x100   :  { %v119_v33 = vmul.f32 0.00390625, %v393_v32  ;;  %v394_v34 = vpop.f32.mrb[6].mxu0 }
 0x101   :  { %v395_v35 = vpop.f32.mrb[7].mxu0 }
 0x102   :  { %v396_v36 = vadd.f32 %v395_v35, %v394_v34  ;;  %123 = vxpose.xlu0.b32.cont [3/4] (short) (narrow) %v119_v33, 8  ;;  %v325_v33 = vmul.f32 0.3, %v322_v27 }
 0x104   :  { %v120_v37 = vmul.f32 0.00390625, %v396_v36  ;;  %v276_v36 = vsub.s32 %v273_v30, %v275_v1 }
 0x106   :  { %124 = vxpose.xlu0.b32.end [4/4] (short) (narrow) %v120_v37, 8  ;;  %v328_v37 = vsub.s32 0, %v275_v1 }
 0x17a   :  { %v137_v38 = vpop.trf.xlu0 }
 0x17b   :  { %352 = vmatmul.mubr.msk.f32.vlgmr.msra.gmra.mrb[0].mxu1 %vm153_vm0, %v137_v38 }
 0x24e   :  { %v223_v39 = vpop.f32.mrb[0].mxu1 }
 0x24f   :  { %v225_v40 = vpop.f32.mrb[1].mxu1  ;;  %v229_v41 = vsel %vm228_vm1, %v223_v39, inf }
 0x250   :  { %v230_v42 = vsel %vm228_vm1, %v225_v40, inf }
 0x251   :  { %v231_v43 = vmin.f32 %v229_v41, %v230_v42  ;;  %v335_v41 = vcombine.high %v325_v33, %v325_v33 }
 0x253   :  { %232 = vmin.xlane.f32.xlu1 %v231_v43 }
 0x2e0   :  { %v233_v44 = vpop.xlane.xlu1 %232 }
 0x2e1   :  { %v234_v45 = vrot.slane %v233_v44, 4 }
 0x2e3   :  { %v235_v46 = vmin.f32 %v233_v44, %v234_v45 }
 0x2e5   :  { %v236_v47 = vrot.slane %v235_v46, 2 }
 0x2e7   :  { %v237_v48 = vmin.f32 %v235_v46, %v236_v47 }
 0x2e9   :  { %v238_v49 = vrot.slane %v237_v48, 1 }
 0x2eb   :  { %v239_v50 = vmin.f32 %v237_v48, %v238_v49 }
 0x2ed   :  { %421 = vpush %v239_v50 }
 0x31e   :  { %s422_s1 = spop %421 }
 0x31f   :  { %v241_v51 = vstv %s422_s1 }
 0x320   :  { %v242_v52 = vsub.f32 %v223_v39, %v241_v51  ;;  %v243_v53 = vsub.f32 %v225_v40, %v241_v51 }
 0x322   :  { %v244_v54 = vsel %vm228_vm1, %v242_v52, -inf  ;;  %v245_v55 = vsel %vm228_vm1, %v243_v53, -inf }
 0x323   :  { %v246_v56 = vmax.f32 %v244_v54, %v245_v55 }
 0x325   :  { %247 = vmax.xlane.f32.xlu1 %v246_v56 }
 0x3b2   :  { %v248_v57 = vpop.xlane.xlu1 %247 }
 0x3b3   :  { %v249_v58 = vrot.slane %v248_v57, 4 }
 0x3b5   :  { %v250_v59 = vmax.f32 %v248_v57, %v249_v58 }
 0x3b7   :  { %v251_v60 = vrot.slane %v250_v59, 2 }
 0x3b9   :  { %v252_v61 = vmax.f32 %v250_v59, %v251_v60 }
 0x3bb   :  { %v253_v62 = vrot.slane %v252_v61, 1 }
 0x3bd   :  { %v254_v63 = vmax.f32 %v252_v61, %v253_v62 }
 0x3bf   :  { %423 = vpush %v254_v63 }
 0x3f0   :  { %s424_s22 = spop %423 }
 0x3f1   :  { %v256_v14 = vstv %s424_s22 }
 0x3f2   :  { %v257_v17 = vmax.f32 %v256_v14, 1e-12 }
 0x3f4   :  { %431 = vrcp.f32 %v257_v17 }
 0x3fe   :  { %v432_v21 = vpop.eup %431 }
 0x3ff   :  { %v259_v22 = vmul.f32 255.0, %v432_v21 }
 0x401   :  { %v260_v25 = vmul.f32 %v259_v22, %v242_v52  ;;  %v261_v26 = vmul.f32 %v259_v22, %v243_v53 }
 0x403   :  { %v262_v28 = vmax.f32 %v260_v25, 0.0  ;;  %v263_v29 = vmax.f32 %v261_v26, 0.0 }
 0x405   :  { %v264_v31 = vmin.f32 %v262_v28, 255.0  ;;  %v265_v32 = vmin.f32 %v263_v29, 255.0 }
 0x407   :  { %v266_v34 = vfloor.f32 %v264_v31  ;;  %v267_v35 = vfloor.f32 %v265_v32 }
 0x409   :  { %v270_v38 = vcombine.low %v266_v34, %v267_v35  ;;  %v323_v39 = vmul.f32 0.5, %v266_v34  ;;  %v324_v40 = vmul.f32 0.5, %v267_v35 }
 0x40b   :  { %v277_v42 = vrot.slane %v270_v38, %v276_v36  ;;  %v329_v43 = vrot.slane %v323_v39, %v328_v37  ;;  %v333_v44 = vrot.slane %v324_v40, %v328_v37 }
 0x40d   :  { %v284_v45 = vrot.slane %v277_v42, %v276_v36  ;;  %v337_v46 = vadd.f32 %v329_v43, %v325_v33  ;;  %v338_v47 = vadd.f32 %v335_v41, %v333_v44 }
 0x40f   :  { %290 = vst.msk [vmem:[%s528_s3] sm:$0x3] %vm288_vm4, %v284_v45  ;;  %v341_v48 = vcombine.low %v337_v46, %v338_v47 }
 0x411   :  { %343 = vst [vmem:[%s529_s4] sm:$0x77] %v341_v48 }

</bundles_post_ra>
